<compile_context>
chip_gen: v7x
topology: tpu7x:2x2x1
jax: 0.10.0
libtpu: 0.0.40
codegen_flags: <defaults>
</compile_context>

<pallas_src>
import jax
import jax.numpy as jnp
import numpy as np
from jax import lax
from jax.experimental import pallas as pl
from jax.experimental.pallas import tpu as pltpu


def encoder_block_kernel(x_ref, w1_ref, b1_ref, w2_ref, b2_ref, mask_ref,
                         y_ref, p_ref):
    """One segment-aligned lane tile of the folded polyphase slab.

    x_ref   : (2, in_c, Wb + 6)  even/odd input phases, 3 zero halo cols per side
    w1_ref  : (3, out_c, in_c)   conv1 weights, tap-major
    b1_ref  : (out_c, 1)
    w2_ref  : (3, out_c, out_c)  conv2 weights, tap-major
    b2_ref  : (out_c, 1)
    mask_ref: (2, Wb + 4) f32    per-phase valid-column masks for the conv1 act.
    y_ref   : (2, out_c, Wb)     conv_block output (even/odd phases)
    p_ref   : (out_c, Wb)        MaxPool1d(2) output (already decimated)
    """
    wb = y_ref.shape[-1]
    wh = wb + 4                       # conv1 activation width (phase idx m = i - 2)
    wy = wb + 2                       # conv2 output width      (phase idx m = i - 1)
    f32 = jnp.float32

    ex = x_ref[0]                     # (in_c, wb + 6), phase idx m = j - 3
    ox = x_ref[1]

    # ---- conv1 (both phases): 3 MXU dots each on statically shifted views ----
    e1 = ex[:, 1:1 + wh]              # E[m]
    o1 = ox[:, 1:1 + wh]              # O[m]
    o0 = ox[:, 0:wh]                  # O[m-1]
    e2 = ex[:, 2:2 + wh]              # E[m+1]

    w10, w11, w12 = w1_ref[0], w1_ref[1], w1_ref[2]
    pre_e = (jnp.dot(w10, o0, preferred_element_type=f32)
             + jnp.dot(w11, e1, preferred_element_type=f32)
             + jnp.dot(w12, o1, preferred_element_type=f32))
    pre_o = (jnp.dot(w10, e1, preferred_element_type=f32)
             + jnp.dot(w11, o1, preferred_element_type=f32)
             + jnp.dot(w12, e2, preferred_element_type=f32))

    # Bias + ReLU; re-zero the per-segment padding columns so the activation is
    # itself a correctly zero-padded conv2 input ('same' padding, PyTorch semantics).
    h_e = jnp.maximum(pre_e + b1_ref[...], 0.0) * mask_ref[0:1, :]   # (out_c, wh)
    h_o = jnp.maximum(pre_o + b1_ref[...], 0.0) * mask_ref[1:2, :]

    # ---- conv2 (both phases) ----
    he1 = h_e[:, 1:1 + wy]            # H_e[m]
    ho1 = h_o[:, 1:1 + wy]            # H_o[m]
    ho0 = h_o[:, 0:wy]                # H_o[m-1]
    he2 = h_e[:, 2:2 + wy]            # H_e[m+1]

    w20, w21, w22 = w2_ref[0], w2_ref[1], w2_ref[2]
    ypre_e = (jnp.dot(w20, ho0, preferred_element_type=f32)
              + jnp.dot(w21, he1, preferred_element_type=f32)
              + jnp.dot(w22, ho1, preferred_element_type=f32))
    ypre_o = (jnp.dot(w20, he1, preferred_element_type=f32)
              + jnp.dot(w21, ho1, preferred_element_type=f32)
              + jnp.dot(w22, he2, preferred_element_type=f32))
    y_e = jnp.maximum(ypre_e + b2_ref[...], 0.0)                     # (out_c, wy)
    y_o = jnp.maximum(ypre_o + b2_ref[...], 0.0)

    # conv_block output: two unmasked, lane-dense, full-block stores.
    y_ref[0] = y_e[:, 1:1 + wb].astype(y_ref.dtype)
    y_ref[1] = y_o[:, 1:1 + wb].astype(y_ref.dtype)

    # MaxPool1d(2): pooled[q] = max(y[2q], y[2q+1]) = max(y_odd[q], y_even[q+1])
    # in phase coordinates -> already-decimated half-width result, one dense store.
    # (The last column of each segment is padding that the wrapper discards.)
    p_ref[...] = jnp.maximum(y_o[:, 1:1 + wb],
                             y_e[:, 2:2 + wb]).astype(p_ref.dtype)

    # TODO(synk): nn.Dropout(0.25) is the identity in eval mode; training-mode
    # stochastic masking (pltpu.prng_*) is not implemented here.


def _vmem_budget_bytes():
    """Per-step VMEM budget for lane-tile sizing (chip-aware when query works)."""
    try:
        cap = int(pltpu.get_tpu_info().vmem_capacity_bytes)
    except Exception:
        cap = 64 * 1024 * 1024      # conservative (v7x-sized) fallback
    return min(12 * 1024 * 1024, cap // 5)


def encoder_block_forward(x, w1, b1, w2, b2, *, segments_per_block=None):
    """Fused encoder_block forward (eval mode).

    x : (N, in_c, L) float32, L even
    w1: (out_c, in_c, 3),  b1: (out_c,)
    w2: (out_c, out_c, 3), b2: (out_c,)
    Returns (x_out, p_out): conv_block output (N, out_c, L), pooled (N, out_c, L//2).
    """
    N, in_c, L = x.shape
    out_c, w_in_c, K = w1.shape
    assert w_in_c == in_c and w2.shape == (out_c, out_c, K)
    assert K == 3, "kernel is specialized to kernel_size=3, padding=1"
    assert L % 2 == 0, "MaxPool1d(2) path assumes an even length"
    Lp = L + 2                 # zero-padded per-batch segment length
    Hp = Lp // 2               # per-segment phase (half) length
    dtype = x.dtype

    # ---- lane tiling: S whole segments per grid step (segment-aligned blocks) ----
    if segments_per_block is None:
        budget = _vmem_budget_bytes()
        words_per_lane = 8 * in_c + 16 * out_c            # rough live-VMEM words/lane
        lanes_cap = max(Hp, budget // (4 * words_per_lane))
        target_lanes = min(max(512, Hp), min(lanes_cap, 4096))
        s_cap = max(1, min(N, target_lanes // Hp))
        segments_per_block = max(d for d in range(1, N + 1)
                                 if N % d == 0 and d <= s_cap)
    S = segments_per_block
    assert N % S == 0
    G = N // S                  # number of lane tiles (grid length)
    Wb = S * Hp                 # lanes per block
    HALO = 3
    Wx = Wb + 2 * HALO
    Wh = Wb + 4

    # ---- fold: zero-pad segments, split even/odd phases, fold batch onto lanes,
    #      add per-block halo zeros (one XLA layout pass). ----
    xpad = jnp.pad(x, ((0, 0), (0, 0), (1, 1)))                       # (N, in_c, Lp)
    xf = (xpad.reshape(G, S, in_c, Hp, 2)
              .transpose(0, 4, 2, 1, 3)
              .reshape(G, 2, in_c, Wb))
    x_in = jnp.pad(xf, ((0, 0), (0, 0), (0, 0), (HALO, HALO)))        # (G, 2, in_c, Wx)

    # Tap-major weights; biases as (out_c, 1) for a single lane-broadcast add.
    w1t = jnp.transpose(w1, (2, 0, 1)).astype(jnp.float32)            # (3, out_c, in_c)
    w2t = jnp.transpose(w2, (2, 0, 1)).astype(jnp.float32)            # (3, out_c, out_c)
    b1c = b1.reshape(out_c, 1).astype(jnp.float32)
    b2c = b2.reshape(out_c, 1).astype(jnp.float32)

    # Per-phase valid-column masks for the conv1 activation (width Wh, static).
    m_idx = np.arange(Wh) - 2
    in_block = (m_idx >= 0) & (m_idx < Wb)
    q = np.mod(m_idx, Hp)
    mask = jnp.asarray(np.stack([in_block & (q != 0),
                                 in_block & (q != Hp - 1)]).astype(np.float32))

    flops = 2 * K * (in_c + out_c) * out_c * N * Lp
    bytes_accessed = 4 * (int(x_in.size) + 3 * G * out_c * Wb
                          + int(w1t.size) + int(w2t.size) + 2 * out_c + int(mask.size))

    y_eo, p_slab = pl.pallas_call(
        encoder_block_kernel,
        out_shape=(jax.ShapeDtypeStruct((G, 2, out_c, Wb), dtype),
                   jax.ShapeDtypeStruct((G, out_c, Wb), dtype)),
        grid=(G,),
        in_specs=[
            pl.BlockSpec((None, 2, in_c, Wx), lambda g: (g, 0, 0, 0)),
            pl.BlockSpec((K, out_c, in_c), lambda g: (0, 0, 0)),
            pl.BlockSpec((out_c, 1), lambda g: (0, 0)),
            pl.BlockSpec((K, out_c, out_c), lambda g: (0, 0, 0)),
            pl.BlockSpec((out_c, 1), lambda g: (0, 0)),
            pl.BlockSpec((2, Wh), lambda g: (0, 0)),
        ],
        out_specs=(
            pl.BlockSpec((None, 2, out_c, Wb), lambda g: (g, 0, 0, 0)),
            pl.BlockSpec((None, out_c, Wb), lambda g: (g, 0, 0)),
        ),
        compiler_params=pltpu.CompilerParams(
            dimension_semantics=("parallel",),
            vmem_limit_bytes=32 * 1024 * 1024),
        cost_estimate=pl.CostEstimate(flops=int(flops), transcendentals=0,
                                      bytes_accessed=int(bytes_accessed)),
    )(x_in, w1t, b1c, w2t, b2c, mask)

    # ---- unfold (pure layout): interleave phases / drop per-segment pad columns ----
    x_out = (y_eo.reshape(G, 2, out_c, S, Hp)
                 .transpose(0, 3, 2, 4, 1)
                 .reshape(N, out_c, Lp)[:, :, 1:1 + L])
    p_out = (p_slab.reshape(G, out_c, S, Hp)
                   .transpose(0, 2, 1, 3)
                   .reshape(N, out_c, Hp)[:, :, :L // 2])
    # TODO(synk): for a full U-Net, keep activations in the folded phase layout
    # between encoder stages to avoid these fold/unfold HBM passes entirely.
    return x_out, p_out


def reference_forward(x, w1, b1, w2, b2):
    """Pure-JAX reference matching PyTorch eval-mode semantics."""
    def conv1d(inp, w, b):
        out = lax.conv_general_dilated(
            inp, w, window_strides=(1,), padding=((1, 1),),
            dimension_numbers=('NCH', 'OIH', 'NCH'),
            precision=lax.Precision.HIGHEST)
        return out + b[None, :, None]

    h = jax.nn.relu(conv1d(x, w1, b1))
    y = jax.nn.relu(conv1d(h, w2, b2))
    p = lax.reduce_window(y, -jnp.inf, lax.max, (1, 1, 2), (1, 1, 2), 'VALID')
    return y, p  # dropout is identity in eval mode


if __name__ == "__main__":
    configs = [
        # (N, in_c, out_c, L, segments_per_block)
        (2, 4, 8, 16, None),   # auto tile choice (single grid step)
        (4, 3, 5, 32, 1),      # forced 4-step pipelined lane-tile path
    ]
    key = jax.random.PRNGKey(0)
    for (N, in_c, out_c, L, spb) in configs:
        key, k_x, k_w1, k_b1, k_w2, k_b2 = jax.random.split(key, 6)
        x = jax.random.normal(k_x, (N, in_c, L), dtype=jnp.float32)
        bound1 = 1.0 / np.sqrt(in_c * 3)
        bound2 = 1.0 / np.sqrt(out_c * 3)
        w1 = jax.random.uniform(k_w1, (out_c, in_c, 3), jnp.float32, -bound1, bound1)
        b1 = jax.random.uniform(k_b1, (out_c,), jnp.float32, -bound1, bound1)
        w2 = jax.random.uniform(k_w2, (out_c, out_c, 3), jnp.float32, -bound2, bound2)
        b2 = jax.random.uniform(k_b2, (out_c,), jnp.float32, -bound2, bound2)

        x_out, p_out = encoder_block_forward(x, w1, b1, w2, b2,
                                             segments_per_block=spb)
        jax.block_until_ready((x_out, p_out))

        x_ref, p_ref = reference_forward(x, w1, b1, w2, b2)
        jax.block_until_ready((x_ref, p_ref))

        assert x_out.shape == (N, out_c, L)
        assert p_out.shape == (N, out_c, L // 2)
        np.testing.assert_allclose(np.asarray(x_out), np.asarray(x_ref),
                                   rtol=1e-4, atol=1e-4)
        np.testing.assert_allclose(np.asarray(p_out), np.asarray(p_ref),
                                   rtol=1e-4, atol=1e-4)
    print("KERNEL_OK")
</pallas_src>

<mosaic_0001>
module attributes {stable_mosaic.version = 11 : i64} {
  func.func @encoder_block_kernel(%arg0: i32, %arg1: memref<1x2x4x24xf32, #tpu.memory_space<vmem>>, %arg2: memref<3x8x4xf32, #tpu.memory_space<vmem>>, %arg3: memref<8x1xf32, #tpu.memory_space<vmem>>, %arg4: memref<3x8x8xf32, #tpu.memory_space<vmem>>, %arg5: memref<8x1xf32, #tpu.memory_space<vmem>>, %arg6: memref<2x22xf32, #tpu.memory_space<vmem>>, %arg7: memref<1x2x8x18xf32, #tpu.memory_space<vmem>>, %arg8: memref<1x8x18xf32, #tpu.memory_space<vmem>>) attributes {dimension_semantics = [#tpu.dimension_semantics<parallel>], iteration_bounds = array<i64: 1>, scalar_prefetch = 0 : i64, scratch_operands = 0 : i64, tpu.core_type = #tpu.core_type<tc>, window_params = [{transform_indices = @transform_0, window_bounds = array<i64: 1, 2, 4, 24>}, {pipeline_mode = #tpu.pipeline_mode<synchronous>, transform_indices = @transform_1, window_bounds = array<i64: 3, 8, 4>}, {pipeline_mode = #tpu.pipeline_mode<synchronous>, transform_indices = @transform_2, window_bounds = array<i64: 8, 1>}, {pipeline_mode = #tpu.pipeline_mode<synchronous>, transform_indices = @transform_3, window_bounds = array<i64: 3, 8, 8>}, {pipeline_mode = #tpu.pipeline_mode<synchronous>, transform_indices = @transform_4, window_bounds = array<i64: 8, 1>}, {pipeline_mode = #tpu.pipeline_mode<synchronous>, transform_indices = @transform_5, window_bounds = array<i64: 2, 22>}, {transform_indices = @transform_6, window_bounds = array<i64: 1, 2, 8, 18>}, {transform_indices = @transform_7, window_bounds = array<i64: 1, 8, 18>}]} {
    %c0 = arith.constant 0 : index
    %c0_0 = arith.constant 0 : index
    %c0_1 = arith.constant 0 : index
    %c0_2 = arith.constant 0 : index
    %0 = vector.load %arg1[%c0, %c0_0, %c0_1, %c0_2] : memref<1x2x4x24xf32, #tpu.memory_space<vmem>>, vector<1x1x4x24xf32>
    %1 = vector.shape_cast %0 : vector<1x1x4x24xf32> to vector<4x24xf32>
    %c0_3 = arith.constant 0 : index
    %c1 = arith.constant 1 : index
    %c0_4 = arith.constant 0 : index
    %c0_5 = arith.constant 0 : index
    %2 = vector.load %arg1[%c0_3, %c1, %c0_4, %c0_5] : memref<1x2x4x24xf32, #tpu.memory_space<vmem>>, vector<1x1x4x24xf32>
    %3 = vector.shape_cast %2 : vector<1x1x4x24xf32> to vector<4x24xf32>
    %4 = vector.extract_strided_slice %1 {offsets = [0, 1], sizes = [4, 22], strides = [1, 1]} : vector<4x24xf32> to vector<4x22xf32>
    %5 = vector.extract_strided_slice %3 {offsets = [0, 1], sizes = [4, 22], strides = [1, 1]} : vector<4x24xf32> to vector<4x22xf32>
    %6 = vector.extract_strided_slice %3 {offsets = [0, 0], sizes = [4, 22], strides = [1, 1]} : vector<4x24xf32> to vector<4x22xf32>
    %7 = vector.extract_strided_slice %1 {offsets = [0, 2], sizes = [4, 22], strides = [1, 1]} : vector<4x24xf32> to vector<4x22xf32>
    %c0_6 = arith.constant 0 : index
    %c0_7 = arith.constant 0 : index
    %c0_8 = arith.constant 0 : index
    %8 = vector.load %arg2[%c0_6, %c0_7, %c0_8] : memref<3x8x4xf32, #tpu.memory_space<vmem>>, vector<1x8x4xf32>
    %9 = vector.shape_cast %8 : vector<1x8x4xf32> to vector<8x4xf32>
    %c1_9 = arith.constant 1 : index
    %c0_10 = arith.constant 0 : index
    %c0_11 = arith.constant 0 : index
    %10 = vector.load %arg2[%c1_9, %c0_10, %c0_11] : memref<3x8x4xf32, #tpu.memory_space<vmem>>, vector<1x8x4xf32>
    %11 = vector.shape_cast %10 : vector<1x8x4xf32> to vector<8x4xf32>
    %c2 = arith.constant 2 : index
    %c0_12 = arith.constant 0 : index
    %c0_13 = arith.constant 0 : index
    %12 = vector.load %arg2[%c2, %c0_12, %c0_13] : memref<3x8x4xf32, #tpu.memory_space<vmem>>, vector<1x8x4xf32>
    %13 = vector.shape_cast %12 : vector<1x8x4xf32> to vector<8x4xf32>
    %cst = arith.constant dense<0.000000e+00> : vector<8x22xf32>
    %14 = tpu.matmul %9, %6, %cst {dimension_numbers = #tpu.dot_dimension_numbers<[1], [0], [0], [1], [0, 0, 1, 1], [], []>} : vector<8x4xf32>, vector<4x22xf32>, vector<8x22xf32> -> vector<8x22xf32>
    %cst_14 = arith.constant dense<0.000000e+00> : vector<8x22xf32>
    %15 = tpu.matmul %11, %4, %cst_14 {dimension_numbers = #tpu.dot_dimension_numbers<[1], [0], [0], [1], [0, 0, 1, 1], [], []>} : vector<8x4xf32>, vector<4x22xf32>, vector<8x22xf32> -> vector<8x22xf32>
    %16 = arith.addf %14, %15 : vector<8x22xf32>
    %cst_15 = arith.constant dense<0.000000e+00> : vector<8x22xf32>
    %17 = tpu.matmul %13, %5, %cst_15 {dimension_numbers = #tpu.dot_dimension_numbers<[1], [0], [0], [1], [0, 0, 1, 1], [], []>} : vector<8x4xf32>, vector<4x22xf32>, vector<8x22xf32> -> vector<8x22xf32>
    %18 = arith.addf %16, %17 : vector<8x22xf32>
    %cst_16 = arith.constant dense<0.000000e+00> : vector<8x22xf32>
    %19 = tpu.matmul %9, %4, %cst_16 {dimension_numbers = #tpu.dot_dimension_numbers<[1], [0], [0], [1], [0, 0, 1, 1], [], []>} : vector<8x4xf32>, vector<4x22xf32>, vector<8x22xf32> -> vector<8x22xf32>
    %cst_17 = arith.constant dense<0.000000e+00> : vector<8x22xf32>
    %20 = tpu.matmul %11, %5, %cst_17 {dimension_numbers = #tpu.dot_dimension_numbers<[1], [0], [0], [1], [0, 0, 1, 1], [], []>} : vector<8x4xf32>, vector<4x22xf32>, vector<8x22xf32> -> vector<8x22xf32>
    %21 = arith.addf %19, %20 : vector<8x22xf32>
    %cst_18 = arith.constant dense<0.000000e+00> : vector<8x22xf32>
    %22 = tpu.matmul %13, %7, %cst_18 {dimension_numbers = #tpu.dot_dimension_numbers<[1], [0], [0], [1], [0, 0, 1, 1], [], []>} : vector<8x4xf32>, vector<4x22xf32>, vector<8x22xf32> -> vector<8x22xf32>
    %23 = arith.addf %21, %22 : vector<8x22xf32>
    %c0_19 = arith.constant 0 : index
    %c0_20 = arith.constant 0 : index
    %24 = vector.load %arg3[%c0_19, %c0_20] : memref<8x1xf32, #tpu.memory_space<vmem>>, vector<8x1xf32>
    %25 = vector.broadcast %24 : vector<8x1xf32> to vector<8x22xf32>
    %26 = arith.addf %18, %25 : vector<8x22xf32>
    %cst_21 = arith.constant 0.000000e+00 : f32
    %27 = vector.broadcast %cst_21 : f32 to vector<8x22xf32>
    %28 = arith.maximumf %26, %27 : vector<8x22xf32>
    %c0_22 = arith.constant 0 : index
    %c0_23 = arith.constant 0 : index
    %29 = vector.load %arg6[%c0_22, %c0_23] : memref<2x22xf32, #tpu.memory_space<vmem>>, vector<1x22xf32>
    %30 = vector.broadcast %29 : vector<1x22xf32> to vector<8x22xf32>
    %31 = arith.mulf %28, %30 : vector<8x22xf32>
    %c0_24 = arith.constant 0 : index
    %c0_25 = arith.constant 0 : index
    %32 = vector.load %arg3[%c0_24, %c0_25] : memref<8x1xf32, #tpu.memory_space<vmem>>, vector<8x1xf32>
    %33 = vector.broadcast %32 : vector<8x1xf32> to vector<8x22xf32>
    %34 = arith.addf %23, %33 : vector<8x22xf32>
    %cst_26 = arith.constant 0.000000e+00 : f32
    %35 = vector.broadcast %cst_26 : f32 to vector<8x22xf32>
    %36 = arith.maximumf %34, %35 : vector<8x22xf32>
    %c1_27 = arith.constant 1 : index
    %c0_28 = arith.constant 0 : index
    %37 = vector.load %arg6[%c1_27, %c0_28] : memref<2x22xf32, #tpu.memory_space<vmem>>, vector<1x22xf32>
    %38 = vector.broadcast %37 : vector<1x22xf32> to vector<8x22xf32>
    %39 = arith.mulf %36, %38 : vector<8x22xf32>
    %40 = vector.extract_strided_slice %31 {offsets = [0, 1], sizes = [8, 20], strides = [1, 1]} : vector<8x22xf32> to vector<8x20xf32>
    %41 = vector.extract_strided_slice %39 {offsets = [0, 1], sizes = [8, 20], strides = [1, 1]} : vector<8x22xf32> to vector<8x20xf32>
    %42 = vector.extract_strided_slice %39 {offsets = [0, 0], sizes = [8, 20], strides = [1, 1]} : vector<8x22xf32> to vector<8x20xf32>
    %43 = vector.extract_strided_slice %31 {offsets = [0, 2], sizes = [8, 20], strides = [1, 1]} : vector<8x22xf32> to vector<8x20xf32>
    %c0_29 = arith.constant 0 : index
    %c0_30 = arith.constant 0 : index
    %c0_31 = arith.constant 0 : index
    %44 = vector.load %arg4[%c0_29, %c0_30, %c0_31] : memref<3x8x8xf32, #tpu.memory_space<vmem>>, vector<1x8x8xf32>
    %45 = vector.shape_cast %44 : vector<1x8x8xf32> to vector<8x8xf32>
    %c1_32 = arith.constant 1 : index
    %c0_33 = arith.constant 0 : index
    %c0_34 = arith.constant 0 : index
    %46 = vector.load %arg4[%c1_32, %c0_33, %c0_34] : memref<3x8x8xf32, #tpu.memory_space<vmem>>, vector<1x8x8xf32>
    %47 = vector.shape_cast %46 : vector<1x8x8xf32> to vector<8x8xf32>
    %c2_35 = arith.constant 2 : index
    %c0_36 = arith.constant 0 : index
    %c0_37 = arith.constant 0 : index
    %48 = vector.load %arg4[%c2_35, %c0_36, %c0_37] : memref<3x8x8xf32, #tpu.memory_space<vmem>>, vector<1x8x8xf32>
    %49 = vector.shape_cast %48 : vector<1x8x8xf32> to vector<8x8xf32>
    %cst_38 = arith.constant dense<0.000000e+00> : vector<8x20xf32>
    %50 = tpu.matmul %45, %42, %cst_38 {dimension_numbers = #tpu.dot_dimension_numbers<[1], [0], [0], [1], [0, 0, 1, 1], [], []>} : vector<8x8xf32>, vector<8x20xf32>, vector<8x20xf32> -> vector<8x20xf32>
    %cst_39 = arith.constant dense<0.000000e+00> : vector<8x20xf32>
    %51 = tpu.matmul %47, %40, %cst_39 {dimension_numbers = #tpu.dot_dimension_numbers<[1], [0], [0], [1], [0, 0, 1, 1], [], []>} : vector<8x8xf32>, vector<8x20xf32>, vector<8x20xf32> -> vector<8x20xf32>
    %52 = arith.addf %50, %51 : vector<8x20xf32>
    %cst_40 = arith.constant dense<0.000000e+00> : vector<8x20xf32>
    %53 = tpu.matmul %49, %41, %cst_40 {dimension_numbers = #tpu.dot_dimension_numbers<[1], [0], [0], [1], [0, 0, 1, 1], [], []>} : vector<8x8xf32>, vector<8x20xf32>, vector<8x20xf32> -> vector<8x20xf32>
    %54 = arith.addf %52, %53 : vector<8x20xf32>
    %cst_41 = arith.constant dense<0.000000e+00> : vector<8x20xf32>
    %55 = tpu.matmul %45, %40, %cst_41 {dimension_numbers = #tpu.dot_dimension_numbers<[1], [0], [0], [1], [0, 0, 1, 1], [], []>} : vector<8x8xf32>, vector<8x20xf32>, vector<8x20xf32> -> vector<8x20xf32>
    %cst_42 = arith.constant dense<0.000000e+00> : vector<8x20xf32>
    %56 = tpu.matmul %47, %41, %cst_42 {dimension_numbers = #tpu.dot_dimension_numbers<[1], [0], [0], [1], [0, 0, 1, 1], [], []>} : vector<8x8xf32>, vector<8x20xf32>, vector<8x20xf32> -> vector<8x20xf32>
    %57 = arith.addf %55, %56 : vector<8x20xf32>
    %cst_43 = arith.constant dense<0.000000e+00> : vector<8x20xf32>
    %58 = tpu.matmul %49, %43, %cst_43 {dimension_numbers = #tpu.dot_dimension_numbers<[1], [0], [0], [1], [0, 0, 1, 1], [], []>} : vector<8x8xf32>, vector<8x20xf32>, vector<8x20xf32> -> vector<8x20xf32>
    %59 = arith.addf %57, %58 : vector<8x20xf32>
    %c0_44 = arith.constant 0 : index
    %c0_45 = arith.constant 0 : index
    %60 = vector.load %arg5[%c0_44, %c0_45] : memref<8x1xf32, #tpu.memory_space<vmem>>, vector<8x1xf32>
    %61 = vector.broadcast %60 : vector<8x1xf32> to vector<8x20xf32>
    %62 = arith.addf %54, %61 : vector<8x20xf32>
    %cst_46 = arith.constant 0.000000e+00 : f32
    %63 = vector.broadcast %cst_46 : f32 to vector<8x20xf32>
    %64 = arith.maximumf %62, %63 : vector<8x20xf32>
    %c0_47 = arith.constant 0 : index
    %c0_48 = arith.constant 0 : index
    %65 = vector.load %arg5[%c0_47, %c0_48] : memref<8x1xf32, #tpu.memory_space<vmem>>, vector<8x1xf32>
    %66 = vector.broadcast %65 : vector<8x1xf32> to vector<8x20xf32>
    %67 = arith.addf %59, %66 : vector<8x20xf32>
    %cst_49 = arith.constant 0.000000e+00 : f32
    %68 = vector.broadcast %cst_49 : f32 to vector<8x20xf32>
    %69 = arith.maximumf %67, %68 : vector<8x20xf32>
    %70 = vector.extract_strided_slice %64 {offsets = [0, 1], sizes = [8, 18], strides = [1, 1]} : vector<8x20xf32> to vector<8x18xf32>
    %c0_50 = arith.constant 0 : index
    %c0_51 = arith.constant 0 : index
    %c0_52 = arith.constant 0 : index
    %c0_53 = arith.constant 0 : index
    %71 = vector.load %arg7[%c0_50, %c0_51, %c0_52, %c0_53] : memref<1x2x8x18xf32, #tpu.memory_space<vmem>>, vector<1x1x8x18xf32>
    %72 = vector.shape_cast %71 : vector<1x1x8x18xf32> to vector<8x18xf32>
    %73 = vector.shape_cast %70 : vector<8x18xf32> to vector<1x1x8x18xf32>
    tpu.vector_store %arg7[%c0_50, %c0_51, %c0_52, %c0_53], %73 {strides = array<i32>} : memref<1x2x8x18xf32, #tpu.memory_space<vmem>>, vector<1x1x8x18xf32>,
    %74 = vector.extract_strided_slice %69 {offsets = [0, 1], sizes = [8, 18], strides = [1, 1]} : vector<8x20xf32> to vector<8x18xf32>
    %c0_54 = arith.constant 0 : index
    %c1_55 = arith.constant 1 : index
    %c0_56 = arith.constant 0 : index
    %c0_57 = arith.constant 0 : index
    %75 = vector.load %arg7[%c0_54, %c1_55, %c0_56, %c0_57] : memref<1x2x8x18xf32, #tpu.memory_space<vmem>>, vector<1x1x8x18xf32>
    %76 = vector.shape_cast %75 : vector<1x1x8x18xf32> to vector<8x18xf32>
    %77 = vector.shape_cast %74 : vector<8x18xf32> to vector<1x1x8x18xf32>
    tpu.vector_store %arg7[%c0_54, %c1_55, %c0_56, %c0_57], %77 {strides = array<i32>} : memref<1x2x8x18xf32, #tpu.memory_space<vmem>>, vector<1x1x8x18xf32>,
    %78 = vector.extract_strided_slice %69 {offsets = [0, 1], sizes = [8, 18], strides = [1, 1]} : vector<8x20xf32> to vector<8x18xf32>
    %79 = vector.extract_strided_slice %64 {offsets = [0, 2], sizes = [8, 18], strides = [1, 1]} : vector<8x20xf32> to vector<8x18xf32>
    %80 = arith.maximumf %78, %79 : vector<8x18xf32>
    %c0_58 = arith.constant 0 : index
    %c0_59 = arith.constant 0 : index
    %c0_60 = arith.constant 0 : index
    %81 = vector.load %arg8[%c0_58, %c0_59, %c0_60] : memref<1x8x18xf32, #tpu.memory_space<vmem>>, vector<1x8x18xf32>
    %82 = vector.shape_cast %81 : vector<1x8x18xf32> to vector<8x18xf32>
    %83 = vector.shape_cast %80 : vector<8x18xf32> to vector<1x8x18xf32>
    tpu.vector_store %arg8[%c0_58, %c0_59, %c0_60], %83 {strides = array<i32>} : memref<1x8x18xf32, #tpu.memory_space<vmem>>, vector<1x8x18xf32>,
    return
  }
  func.func @transform_0(%arg0: i32) -> (i32, i32, i32, i32) {
    %c0_i32 = arith.constant 0 : i32
    %c0_i32_0 = arith.constant 0 : i32
    %c0_i32_1 = arith.constant 0 : i32
    %c0_i32_2 = arith.constant 0 : i32
    return %arg0, %c0_i32, %c0_i32_0, %c0_i32_1 : i32, i32, i32, i32
  }
  func.func @transform_1(%arg0: i32) -> (i32, i32, i32) {
    %c0_i32 = arith.constant 0 : i32
    %c0_i32_0 = arith.constant 0 : i32
    %c0_i32_1 = arith.constant 0 : i32
    %c0_i32_2 = arith.constant 0 : i32
    return %c0_i32, %c0_i32_0, %c0_i32_1 : i32, i32, i32
  }
  func.func @transform_2(%arg0: i32) -> (i32, i32) {
    %c0_i32 = arith.constant 0 : i32
    %c0_i32_0 = arith.constant 0 : i32
    %c0_i32_1 = arith.constant 0 : i32
    return %c0_i32, %c0_i32_0 : i32, i32
  }
  func.func @transform_3(%arg0: i32) -> (i32, i32, i32) {
    %c0_i32 = arith.constant 0 : i32
    %c0_i32_0 = arith.constant 0 : i32
    %c0_i32_1 = arith.constant 0 : i32
    %c0_i32_2 = arith.constant 0 : i32
    return %c0_i32, %c0_i32_0, %c0_i32_1 : i32, i32, i32
  }
  func.func @transform_4(%arg0: i32) -> (i32, i32) {
    %c0_i32 = arith.constant 0 : i32
    %c0_i32_0 = arith.constant 0 : i32
    %c0_i32_1 = arith.constant 0 : i32
    return %c0_i32, %c0_i32_0 : i32, i32
  }
  func.func @transform_5(%arg0: i32) -> (i32, i32) {
    %c0_i32 = arith.constant 0 : i32
    %c0_i32_0 = arith.constant 0 : i32
    %c0_i32_1 = arith.constant 0 : i32
    return %c0_i32, %c0_i32_0 : i32, i32
  }
  func.func @transform_6(%arg0: i32) -> (i32, i32, i32, i32) {
    %c0_i32 = arith.constant 0 : i32
    %c0_i32_0 = arith.constant 0 : i32
    %c0_i32_1 = arith.constant 0 : i32
    %c0_i32_2 = arith.constant 0 : i32
    return %arg0, %c0_i32, %c0_i32_0, %c0_i32_1 : i32, i32, i32, i32
  }
  func.func @transform_7(%arg0: i32) -> (i32, i32, i32) {
    %c0_i32 = arith.constant 0 : i32
    %c0_i32_0 = arith.constant 0 : i32
    %c0_i32_1 = arith.constant 0 : i32
    return %arg0, %c0_i32, %c0_i32_0 : i32, i32, i32
  }
}

</mosaic_0001>

<bundles_post_ra>
// kernel: tpu_custom_call.1
= control target key start
LH: loop header
LB: loop body
LE: loop exit
PB: predicated region body
PF: predicated region fallthrough
CT: control target
= control target key end

     0   :  { %13 = vsyncpa [#allocation3], 0  ;;  %s1180_s26 = smov 127   ;;  %s1181_s27 = smov 126   ;;  %vm42_vm0 = vcmask 1043456   ;;  %v1182_v2 = vmov 0.0   ;;  %s1355_s0 = inlined_call_operand.vmem [shape: f32[1,2,4,24], index: 0, kind: input, shape index: {}]   ;;  %s1356_s1 = inlined_call_operand.vmem [shape: f32[3,8,4], index: 1, kind: input, shape index: {}]   ;;  %s1357_s2 = inlined_call_operand.vmem [shape: f32[8,1], index: 2, kind: input, shape index: {}]   ;;  %s1358_s3 = inlined_call_operand.vmem [shape: f32[3,8,8], index: 3, kind: input, shape index: {}]   ;;  %s1359_s4 = inlined_call_operand.vmem [shape: f32[8,1], index: 4, kind: input, shape index: {}]   ;;  %s1360_s5 = inlined_call_operand.vmem [shape: f32[2,22], index: 5, kind: input, shape index: {}]   ;;  %s1361_s6 = inlined_call_operand.hbm [shape: f32[1,2,8,18], index: 6, kind: output, shape index: {0}]   ;;  %s1362_s7 = inlined_call_operand.hbm [shape: f32[1,8,18], index: 7, kind: output, shape index: {1}]  }
   0x1   :  { %v27_v0 = vld [vmem:[%s1355_s0] sm:$0xf]  ;;  %v1012_v1 = vld [vmem:[%s1355_s0 + $0x4] sm:$0xf]  ;;  %1061 = vmatprep.subr.mxu0 %v1182_v2  ;;  %1066 = vmatprep.subr.mxu1 %v1182_v2  ;;  %vm38_vm1 = vcmask 31744  }
   0x2   :  { %36 = vrot.lane.b32.xlu0 %v27_v0, %s1180_s26  ;;  %409 = vrot.lane.b32.xlu1 %v27_v0, %s1181_s27  ;;  %v30_v3 = vld [vmem:[%s1356_s1] sm:$0xff] }
   0x3   :  { %14 = vsyncpa [#allocation5], 0  ;;  %vm1183_vm2 = vmmov 0   ;;  %1067 = vmatpush3.msk.msra.mxu1 %vm42_vm0, %v1012_v1  ;;  %v484_v4 = vld [vmem:[%s1357_s2] sm:$0xff]  ;;  %v1184_v5 = vmov 0   ;;  %v1013_v6 = vld [vmem:[%s1356_s1 + $0x8] sm:$0xff] }
   0x4   :  { %1063 = vmatprep.mubr.msk.f32.mxu0 %vm1183_vm2, %v1182_v2  ;;  %1068 = vmatprep.mubr.msk.f32.mxu1 %vm1183_vm2, %v1182_v2  ;;  %v1014_v8 = vld [vmem:[%s1356_s1 + $0x10] sm:$0xff]  ;;  %v1027_v24 = vld [vmem:[%s1360_s5] ss:$0 sm:$0xff]  ;;  %v1028_v33 = vld [vmem:[%s1360_s5 + $0x1] ss:$0 sm:$0xff]  ;;  %vm515_vm3 = vcmask 64512  }
   0x5   :  { %1076 = vmatprep.subr.mxu1 %v1182_v2  ;;  %1069 = vmatmul.mubr.msk.f32.vlgmr.msra.gmra.mrb[0].mxu1 %vm38_vm1, %v30_v3  ;;  %v506_v36 = vld [vmem:[%s1358_s3] sm:$0xff]  ;;  %v1029_v38 = vld [vmem:[%s1358_s3 + $0x8] sm:$0xff]  ;;  %v1030_v40 = vld [vmem:[%s1358_s3 + $0x10] sm:$0xff]  ;;  %vm968_vm4 = vcmask 146432   ;;  %s1185_s3 = smov [#allocation2]  }
   0x6   :  { %191 = vrot.lane.b32.xlu0 %v1012_v1, %s1180_s26  ;;  %1078 = vmatprep.mubr.msk.f32.mxu1 %vm1183_vm2, %v1182_v2  ;;  %v954_v37 = vld [vmem:[%s1359_s4] sm:$0xff]  ;;  %s987_s22 = sshll.u32 %s1185_s3, 4  ;;  %s988_s22 = int_to_ptr.vmem [resolvable:$true] %s987_s22 }
   0x7   :  { %1130 = vset.pattern.permute.xlu1 %v1184_v5  ;;  %1131 = vset.pattern.permute.xlu0 %v1184_v5  ;;  %s1132_s23 = scalar_lea.vmem %s988_s22, 256  ;;  %p1137_p1 = scmp.lt.s32.totalorder %s988_s22, %s988_s22 }
   0x8   :  { %487 = vperm.xlu1 %1130, %v484_v4   ;;  %p1133_p0 = scmp.ne.s32.totalorder %s988_s22, %s1132_s23  ;;  %p1138_p2 = scmp.lt.s32.totalorder %s1132_s23, %s1132_s23 }
   0xa   :  { %p1139_p3 = por %p1138_p2, %p1137_p1 }
   0xc   :  { %p1140_p4 = pnand %p1139_p3, %p1133_p0 }
  0x74   :  { %v37_v7 = vpop.permute.xlu0 %36  ;;  %v410_v10 = vpop.permute.xlu1 %409 }
  0x75   :  { %1062 = vmatpush3.msk.msra.mxu0 %vm42_vm0, %v37_v7 }
  0x76   :  { %1064 = vmatmul.mubr.msk.f32.vlgmr.msra.gmra.mrb[0].mxu0 %vm38_vm1, %v1013_v6  ;;  %1071 = vmatprep.subr.mxu0 %v1182_v2 }
  0x77   :  { %1073 = vmatprep.mubr.msk.f32.mxu0 %vm1183_vm2, %v1182_v2 }
  0x78   :  { %v192_v9 = vpop.permute.xlu0 %191 }
  0x79   :  { %1072 = vmatpush3.msk.msra.mxu0 %vm42_vm0, %v192_v9  ;;  %1077 = vmatpush3.msk.msra.mxu1 %vm42_vm0, %v192_v9 }
  0x7a   :  { %1074 = vmatmul.mubr.msk.f32.vlgmr.msra.gmra.mrb[2].mxu0 %vm38_vm1, %v1014_v8  ;;  %1081 = vmatprep.subr.mxu0 %v1182_v2 }
  0x7b   :  { %1079 = vmatmul.mubr.msk.f32.vlgmr.msra.gmra.mrb[2].mxu1 %vm38_vm1, %v1013_v6  ;;  %1082 = vmatpush3.msk.msra.mxu0 %vm42_vm0, %v37_v7 }
  0x7c   :  { %1083 = vmatprep.mubr.msk.f32.mxu0 %vm1183_vm2, %v1182_v2  ;;  %1086 = vmatprep.subr.mxu1 %v1182_v2 }
  0x7d   :  { %1087 = vmatpush3.msk.msra.mxu1 %vm42_vm0, %v410_v10  ;;  %1088 = vmatprep.mubr.msk.f32.mxu1 %vm1183_vm2, %v1182_v2 }
  0x7e   :  { %1084 = vmatmul.mubr.msk.f32.vlgmr.msra.gmra.mrb[4].mxu0 %vm38_vm1, %v30_v3  ;;  %1096 = vmatprep.subr.mxu1 %v1182_v2 }
  0x7f   :  { %1089 = vmatmul.mubr.msk.f32.vlgmr.msra.gmra.mrb[4].mxu1 %vm38_vm1, %v1014_v8  ;;  %1091 = vmatprep.subr.mxu0 %v1182_v2 }
  0x80   :  { %1093 = vmatprep.mubr.msk.f32.mxu0 %vm1183_vm2, %v1182_v2  ;;  %1098 = vmatprep.mubr.msk.f32.mxu1 %vm1183_vm2, %v1182_v2 }
  0x87   :  { %v488_v17 = vpop.permute.xlu1 %487 }
  0xd8   :  { %v187_v11 = vpop.f32.mrb[0].mxu1 }
  0xd9   :  { %v1070_v12 = vpop.f32.mrb[1].mxu1 }
 0x149   :  { %v111_v13 = vpop.f32.mrb[0].mxu0 }
 0x14a   :  { %v188_v14 = vadd.f32 %v187_v11, %v111_v13  ;;  %v1065_v15 = vpop.f32.mrb[1].mxu0 }
 0x14d   :  { %v264_v16 = vpop.f32.mrb[2].mxu0 }
 0x14e   :  { %v268_v18 = vadd.f32 %v264_v16, %v188_v14  ;;  %v1075_v19 = vpop.f32.mrb[3].mxu0  ;;  %v335_v20 = vpop.f32.mrb[2].mxu1 }
 0x14f   :  { %v1080_v21 = vpop.f32.mrb[3].mxu1 }
 0x150   :  { %v490_v22 = vadd.f32 %v488_v17, %v268_v18 }
 0x151   :  { %v405_v23 = vpop.f32.mrb[4].mxu0 }
 0x152   :  { %v491_v25 = vmax.f32 %v490_v22, 0.0  ;;  %v406_v26 = vadd.f32 %v405_v23, %v335_v20  ;;  %v1085_v27 = vpop.f32.mrb[5].mxu0  ;;  %v479_v28 = vpop.f32.mrb[4].mxu1 }
 0x153   :  { %v1090_v29 = vpop.f32.mrb[5].mxu1 }
 0x154   :  { %v483_v30 = vadd.f32 %v479_v28, %v406_v26  ;;  %v497_v31 = vmul.f32 %v1027_v24, %v491_v25 }
 0x156   :  { %v498_v32 = vadd.f32 %v488_v17, %v483_v30  ;;  %512 = vrot.lane.b32.xlu0 %v497_v31, %s1180_s26 }
 0x158   :  { %v499_v34 = vmax.f32 %v498_v32, 0.0 }
 0x15a   :  { %880 = vrot.lane.b32.xlu0 %v497_v31, %s1181_s27  ;;  %v505_v35 = vmul.f32 %v1028_v33, %v499_v34 }
 0x15c   :  { %663 = vrot.lane.b32.xlu1 %v505_v35, %s1180_s26  ;;  %1097 = vmatpush3.msra.mxu1 %v505_v35 }
 0x15d   :  { %1099 = vmatmul.mubr.msk.f32.vlgmr.msra.gmra.mrb[6].mxu1 %vm515_vm3, %v506_v36  ;;  %1106 = vmatprep.subr.mxu1 %v1182_v2 }
 0x15e   :  { %1108 = vmatprep.mubr.msk.f32.mxu1 %vm1183_vm2, %v1182_v2 }
 0x160   :  { %957 = vperm.xlu1 %1130, %v954_v37  }
 0x1c8   :  { %v513_v39 = vpop.permute.xlu0 %512 }
 0x1c9   :  { %1092 = vmatpush3.msra.mxu0 %v513_v39 }
 0x1ca   :  { %1094 = vmatmul.mubr.msk.f32.vlgmr.msra.gmra.mrb[6].mxu0 %vm515_vm3, %v1029_v38  ;;  %1101 = vmatprep.subr.mxu0 %v1182_v2 }
 0x1cb   :  { %1103 = vmatprep.mubr.msk.f32.mxu0 %vm1183_vm2, %v1182_v2 }
 0x1cc   :  { %v881_v42 = vpop.permute.xlu0 %880 }
 0x1ce   :  { %v664_v41 = vpop.permute.xlu1 %663 }
 0x1cf   :  { %1102 = vmatpush3.msra.mxu0 %v664_v41  ;;  %1107 = vmatpush3.msra.mxu1 %v664_v41 }
 0x1d0   :  { %1104 = vmatmul.mubr.msk.f32.vlgmr.msra.gmra.mrb[8].mxu0 %vm515_vm3, %v1030_v40  ;;  %1111 = vmatprep.subr.mxu0 %v1182_v2 }
 0x1d1   :  { %1116 = vmatprep.subr.mxu1 %v1182_v2  ;;  %1109 = vmatmul.mubr.msk.f32.vlgmr.msra.gmra.mrb[8].mxu1 %vm515_vm3, %v1029_v38 }
 0x1d2   :  { %1112 = vmatpush3.msra.mxu0 %v513_v39  ;;  %1117 = vmatpush3.msra.mxu1 %v881_v42 }
 0x1d3   :  { %1113 = vmatprep.mubr.msk.f32.mxu0 %vm1183_vm2, %v1182_v2  ;;  %1118 = vmatprep.mubr.msk.f32.mxu1 %vm1183_vm2, %v1182_v2 }
 0x1d4   :  { %1114 = vmatmul.mubr.msk.f32.vlgmr.msra.gmra.mrb[10].mxu0 %vm515_vm3, %v506_v36 }
 0x1d5   :  { %1119 = vmatmul.mubr.msk.f32.vlgmr.msra.gmra.mrb[10].mxu1 %vm515_vm3, %v1030_v40 }
 0x1df   :  { %v958_v52 = vpop.permute.xlu1 %957 }
 0x230   :  { %v658_v43 = vpop.f32.mrb[6].mxu1 }
 0x231   :  { %v1100_v44 = vpop.f32.mrb[7].mxu1 }
 0x29d   :  { %v585_v45 = vpop.f32.mrb[6].mxu0 }
 0x29e   :  { %v659_v46 = vadd.f32 %v658_v43, %v585_v45  ;;  %v1095_v47 = vpop.f32.mrb[7].mxu0 }
 0x2a3   :  { %v735_v48 = vpop.f32.mrb[8].mxu0 }
 0x2a4   :  { %v739_v49 = vadd.f32 %v735_v48, %v659_v46  ;;  %v1105_v50 = vpop.f32.mrb[9].mxu0  ;;  %v806_v51 = vpop.f32.mrb[8].mxu1 }
 0x2a5   :  { %v1110_v53 = vpop.f32.mrb[9].mxu1 }
 0x2a6   :  { %v960_v54 = vadd.f32 %v958_v52, %v739_v49 }
 0x2a7   :  { %v876_v55 = vpop.f32.mrb[10].mxu0 }
 0x2a8   :  { %v961_v56 = vmax.f32 %v960_v54, 0.0  ;;  %v877_v57 = vadd.f32 %v876_v55, %v806_v51  ;;  %v949_v58 = vpop.f32.mrb[10].mxu1  ;;  %v1115_v59 = vpop.f32.mrb[11].mxu0 }
 0x2a9   :  { %v1120_v60 = vpop.f32.mrb[11].mxu1 }
 0x2aa   :  { %v953_v61 = vadd.f32 %v949_v58, %v877_v57  ;;  %965 = vrot.lane.b32.xlu0 %v961_v56, %s1180_s26 }
 0x2ac   :  { %v962_v62 = vadd.f32 %v958_v52, %v953_v61 }
 0x2ae   :  { %v963_v63 = vmax.f32 %v962_v62, 0.0 }
 0x2b0   :  { %971 = vrot.lane.b32.xlu1 %v963_v63, %s1180_s26 }
 0x31c   :  { %v966_v0 = vpop.permute.xlu0 %965 }
 0x31d   :  { %969 = vst.msk [vmem:[#allocation2] sm:$0xff] %vm968_vm4, %v966_v0  ;;  %v976_v1 = vmax.f32 %v963_v63, %v966_v0 }
 0x31f   :  { %978 = vrot.lane.b32.xlu0 %v976_v1, %s1180_s26 }
 0x322   :  { %v972_v2 = vpop.permute.xlu1 %971 }
 0x323   :  { %975 = vst.msk [vmem:[#allocation2 + $0x8] sm:$0xff] %vm968_vm4, %v972_v2 }
 0x324   :  { %1143 = shalt.err (!%p1140_p4)
}
 0x325   :  { %s1144_s27 = scalar_lea.hbm %s1361_s6, 256 }
 0x326   :  { %p1145_p5 = scmp.ne.s32.totalorder %s1361_s6, %s1144_s27  ;;  %p1148_p6 = scmp.lt.u32.totalorder %s1144_s27, %s1361_s6 }
 0x328   :  { %p1150_p7 = pnand %p1148_p6, %p1145_p5 }
 0x32a   :  { %1153 = shalt.err (!%p1150_p7)
}
 0x32b   :  { %s1186_s8 = smov 128   ;;  %s1187_s0 = smov 8  }
 0x32c   :  { %993 = dma.vmem_to_hbm [thread:$0]  %s988_s22, 256, %s1361_s6, [#allocation3], %s1186_s8, %s1186_s8, %s1187_s0  }
 0x32d   :  { %s1188_s11 = smov [#allocation4]  }
 0x32e   :  { %s1000_s2 = sshll.u32 %s1188_s11, 4  ;;  %s1001_s2 = int_to_ptr.vmem [resolvable:$true] %s1000_s2 }
 0x32f   :  { %s1154_s12 = scalar_lea.vmem %s1001_s2, 128  ;;  %p1159_p9 = scmp.lt.s32.totalorder %s1001_s2, %s1001_s2 }
 0x330   :  { %p1155_p8 = scmp.ne.s32.totalorder %s1001_s2, %s1154_s12  ;;  %p1160_p10 = scmp.lt.s32.totalorder %s1154_s12, %s1154_s12 }
 0x332   :  { %p1161_p11 = por %p1160_p10, %p1159_p9 }
 0x334   :  { %p1162_p12 = pnand %p1161_p11, %p1155_p8 }
 0x391   :  { %v979_v3 = vpop.permute.xlu0 %978 }
 0x392   :  { %981 = vst.msk [vmem:[#allocation4] sm:$0xff] %vm968_vm4, %v979_v3 }
 0x393   :  { %1165 = shalt.err (!%p1162_p12)
}
 0x394   :  { %s1166_s14 = scalar_lea.hbm %s1362_s7, 128 }
 0x395   :  { %p1167_p13 = scmp.ne.s32.totalorder %s1362_s7, %s1166_s14  ;;  %p1170_p0 = scmp.lt.u32.totalorder %s1166_s14, %s1362_s7 }
 0x397   :  { %p1172_p1 = pnand %p1170_p0, %p1167_p13 }
 0x399   :  { %1175 = shalt.err (!%p1172_p1)
}
 0x39a   :  { %1003 = dma.vmem_to_hbm [thread:$0]  %s1001_s2, 128, %s1362_s7, [#allocation5]  }
 0x39b   :  { %1176 = dma.done.wait [#allocation3], 256  }
 0x39c   :  { %1177 = vsyncadd [#allocation3], 4294967040 }
 0x39d   :  { %1178 = dma.done.wait [#allocation5], 128  }
 0x39e   :  { %1179 = vsyncadd [#allocation5], 4294967168 }
 0x39f   :  { %1010 = vsyncpa [#allocation3], 1 }
 0x3a0   :  { %1011 = vsyncpa [#allocation5], 1 }

</bundles_post_ra>
